<compile_context>
chip_gen: v7x
topology: tpu7x:2x2x1
jax: 0.10.0
libtpu: 0.0.40
codegen_flags: <defaults>
</compile_context>

<pallas_src>
import functools

import jax
import jax.numpy as jnp
from jax import lax
from jax.experimental import pallas as pl
from jax.experimental.pallas import tpu as pltpu


_TL_MAX = 512      # max L tile (lanes); always a multiple of 128 -> unmasked stores
_LANE = 128
_SUBLANE = 8


def _round_up(x, m):
    return ((x + m - 1) // m) * m


def _vmem_budget():
    """~75% of this generation's per-core VMEM (v5e/v6e: 128 MiB, v7x: 64 MiB)."""
    cap = 64 * 1024 * 1024
    try:
        cap = int(getattr(pltpu.get_tpu_info(), "vmem_capacity_bytes", cap))
    except Exception:
        pass
    return (3 * cap) // 4


def _conv_block_kernel(x_ref, w_ref, shift_ref, out_ref, *, K, S, T_phase, TL, Bt):
    """Direct Conv1d + folded-BN + ReLU for one (batch-group, L-tile) grid cell.

    x_ref    : (Bt, S*T_phase, D)  phase-split padded input
               (row s*T_phase + t  ==  zero-padded x at time t*S + s)
    w_ref    : (K, C_pad, D)       BN-folded conv weights
    shift_ref: (C_pad, 1)          folded bias / BN shift (f32)
    out_ref  : (Bt, C_pad, TL)     output tile already in the final (C, L) orientation
    """
    lt = pl.program_id(1)
    l0 = pl.multiple_of(lt * TL, _LANE)
    shift = shift_ref[...]                                          # (C_pad, 1)

    for b in range(Bt):                                             # static, small
        acc = None
        for k in range(K):                                          # static, small
            # T_phase is a multiple of 8, so the only sublane misalignment is k // S.
            start = (k % S) * T_phase + (k // S) + l0
            xs = x_ref[b, pl.ds(start, TL), :]                      # (TL, D)
            wk = w_ref[k]                                           # (C_pad, D)
            part = lax.dot_general(                                 # (C_pad, TL)
                wk, xs, (((1,), (1,)), ((), ())),
                preferred_element_type=jnp.float32)
            acc = part if acc is None else acc + part               # init from 1st dot
        y = jnp.maximum(acc + shift, 0.0)
        out_ref[b] = y.astype(out_ref.dtype)


def conv_block_pallas(x_ph, w_stacked, shift, *, K, S, T_phase, TL, L_pad,
                      out_dtype=jnp.float32):
    """x_ph: (B, S*T_phase, D), w_stacked: (K, C_pad, D), shift: (C_pad, 1)
       -> (B, C_pad, L_pad) in out_dtype."""
    B, T_rows, D = x_ph.shape
    Kw, C_pad, Dw = w_stacked.shape
    assert Kw == K and Dw == D and T_rows == S * T_phase and L_pad % TL == 0
    # Every in-kernel pl.ds stays in-bounds (TPU has no VMEM bounds check).
    assert (K - 1) // S + L_pad <= T_phase, (K, S, L_pad, T_phase)

    n_l_tiles = L_pad // TL
    x_bytes = x_ph.dtype.itemsize
    w_bytes = w_stacked.dtype.itemsize
    o_bytes = jnp.dtype(out_dtype).itemsize
    budget = _vmem_budget()

    # Fold several batch rows into one grid step when the output tile is tiny,
    # but keep >= 2 grid steps so both TensorCores (v7x) stay busy.
    max_bt = B if (n_l_tiles >= 2 or B < 2) else max(1, B // 2)
    max_bt = min(max_bt, 8)
    bt = 1
    for cand in range(1, max_bt + 1):
        if B % cand:
            continue
        est = (2 * cand * T_rows * D * x_bytes        # double-buffered x block
               + 2 * K * C_pad * D * w_bytes          # weights
               + 2 * cand * C_pad * TL * o_bytes      # output tile
               + 2 * C_pad * 4 + (8 << 20))
        if est > budget:
            break
        bt = cand
        if cand * C_pad * TL * o_bytes >= (256 << 10):   # tile already large enough
            break

    grid = (B // bt, n_l_tiles)
    kernel = functools.partial(_conv_block_kernel, K=K, S=S, T_phase=T_phase,
                               TL=TL, Bt=bt)

    # Advisory cost estimate so XLA schedules the surrounding ops sensibly.
    flops = int(2 * B * L_pad * C_pad * D * K)
    bytes_accessed = int(
        x_ph.size * x_bytes + w_stacked.size * w_bytes
        + shift.size * shift.dtype.itemsize + B * C_pad * L_pad * o_bytes)

    vmem_est = int(
        2 * bt * T_rows * D * x_bytes
        + 2 * K * C_pad * D * w_bytes
        + 2 * C_pad * 4
        + 2 * bt * C_pad * TL * o_bytes
        + (4 << 20))
    vmem_limit = int(min(budget, max(vmem_est, 32 * 1024 * 1024)))

    return pl.pallas_call(
        kernel,
        out_shape=jax.ShapeDtypeStruct((B, C_pad, L_pad), out_dtype),
        grid=grid,
        in_specs=[
            # x block depends only on the batch-group -> fetched once, reused over L tiles
            pl.BlockSpec((bt, T_rows, D), lambda bg, lt: (bg, 0, 0)),
            pl.BlockSpec((K, C_pad, D), lambda bg, lt: (0, 0, 0)),
            pl.BlockSpec((C_pad, 1), lambda bg, lt: (0, 0)),
        ],
        out_specs=pl.BlockSpec((bt, C_pad, TL), lambda bg, lt: (bg, 0, lt)),
        compiler_params=pltpu.CompilerParams(
            dimension_semantics=("parallel", "parallel"),
            vmem_limit_bytes=vmem_limit),
        cost_estimate=pl.CostEstimate(
            flops=flops, transcendentals=0, bytes_accessed=bytes_accessed),
    )(x_ph, w_stacked, shift)


def _phase_split(x, P, S, K, L_pad, dtype):
    """(B, T, D) -> (B, S*T_phase, D); row s*T_phase + t holds zero-padded x at t*S + s - P.

    T_phase is padded to a multiple of 8 so per-tap slice starts stay sublane-aligned
    (up to the small k//S residual)."""
    B, T, D = x.shape
    T_phase = _round_up(L_pad + (K - 1) // S, _SUBLANE)
    T_need = S * T_phase
    x = x.astype(dtype)                       # cast first: halves relayout traffic for bf16
    pad_right = max(0, T_need - T - P)
    x_full = jnp.pad(x, ((0, 0), (P, pad_right), (0, 0)))[:, :T_need, :]
    x_ph = x_full.reshape(B, T_phase, S, D).transpose(0, 2, 1, 3).reshape(B, S * T_phase, D)
    return x_ph, T_phase


def conv_encoder_forward(x, params, kernel_sizes, strides, paddings,
                         *, compute_dtype=jnp.float32, out_dtype=jnp.float32):
    """x: (B, T, d_model). Returns (B, C * sum(L_out_i)). Eval-mode BN folded into weights.

    compute_dtype=jnp.bfloat16 uses the bf16 MXU path (f32 accumulation kept)."""
    B, T, d_model = x.shape
    C0 = params[0][0].shape[0]
    assert all(p[0].shape[0] == C0 for p in params), \
        "torch.cat along the length dim requires equal out_channels for all blocks"

    is_bf16 = jnp.dtype(compute_dtype).itemsize == 2
    c_mult = 16 if is_bf16 else 8
    eps = 1e-5
    outs = []
    for (W, b, gamma, beta, rmean, rvar), K, S, P in zip(
            params, kernel_sizes, strides, paddings):
        C = W.shape[0]
        L_out = (T + 2 * P - K) // S + 1
        assert L_out > 0
        # Lane-dense tiles only: never emit an output tile narrower than 128 lanes.
        L128 = _round_up(L_out, _LANE)
        if L128 <= _TL_MAX:
            TL, L_pad = L128, L128                       # single lane-dense tile
        else:
            TL = _TL_MAX
            L_pad = _round_up(L_out, TL)
        C_pad = _round_up(C, c_mult)

        # Fold conv bias + eval-mode BN into a per-channel scale on W and a shift.
        scale = gamma / jnp.sqrt(rvar + eps)             # (C,)
        shift = (b - rmean) * scale + beta               # (C,)
        w_fold = jnp.transpose(W * scale[:, None, None], (2, 0, 1))   # (K, C, D)
        if C_pad != C:
            w_fold = jnp.pad(w_fold, ((0, 0), (0, C_pad - C), (0, 0)))
            shift = jnp.pad(shift, (0, C_pad - C))
        shift2 = shift.reshape(C_pad, 1).astype(jnp.float32)

        x_ph, T_phase = _phase_split(x, P, S, K, L_pad, compute_dtype)
        y = conv_block_pallas(
            x_ph, w_fold.astype(compute_dtype), shift2,
            K=K, S=S, T_phase=T_phase, TL=TL, L_pad=L_pad,
            out_dtype=out_dtype)                          # (B, C_pad, L_pad)
        outs.append(y[:, :C, :L_out])                     # drop channel / length padding

    out = jnp.concatenate(outs, axis=-1)                  # == torch.cat(dim=-1)
    return out.reshape(B, -1)


def _reference_forward(x, params, kernel_sizes, strides, paddings):
    """Pure-JAX reference (lax conv) for correctness check."""
    B, T, d_model = x.shape
    x_ncl = jnp.transpose(x, (0, 2, 1))
    outs = []
    for (W, b, gamma, beta, rmean, rvar), K, S, P in zip(
            params, kernel_sizes, strides, paddings):
        y = lax.conv_general_dilated(
            x_ncl, W, window_strides=(S,), padding=[(P, P)],
            dimension_numbers=("NCH", "OIH", "NCH"))
        y = y + b[None, :, None]
        eps = 1e-5
        y = (y - rmean[None, :, None]) / jnp.sqrt(rvar[None, :, None] + eps)
        y = y * gamma[None, :, None] + beta[None, :, None]
        y = jnp.maximum(y, 0.0)
        outs.append(y)
    out = jnp.concatenate(outs, axis=-1)
    return out.reshape(B, -1)


def init_params(key, d_model, channels, kernel_sizes):
    params = []
    for C, K in zip(channels, kernel_sizes):
        key, k1, k2, k3, k4 = jax.random.split(key, 5)
        fan_in = d_model * K
        bound = 1.0 / jnp.sqrt(fan_in)
        W = jax.random.uniform(k1, (C, d_model, K), jnp.float32, -bound, bound)
        b = jax.random.uniform(k2, (C,), jnp.float32, -bound, bound)
        gamma = 1.0 + 0.1 * jax.random.normal(k3, (C,), jnp.float32)
        beta = 0.1 * jax.random.normal(k4, (C,), jnp.float32)
        rmean = jnp.zeros((C,), jnp.float32)
        rvar = jnp.ones((C,), jnp.float32)
        params.append((W, b, gamma, beta, rmean, rvar))
    return params


def _run_case(key, B, T, d_model, channels, kernel_sizes, strides, paddings,
              *, compute_dtype=jnp.float32, atol=1e-4, rtol=1e-4):
    key, kx = jax.random.split(key)
    x = jax.random.normal(kx, (B, T, d_model), jnp.float32)
    params = init_params(key, d_model, channels, kernel_sizes)
    fwd = functools.partial(conv_encoder_forward, kernel_sizes=kernel_sizes,
                            strides=strides, paddings=paddings,
                            compute_dtype=compute_dtype)
    out = jax.jit(lambda xv: fwd(xv, params))(x)
    out = jax.block_until_ready(out)
    ref = jax.block_until_ready(_reference_forward(x, params, kernel_sizes, strides, paddings))
    assert out.shape == ref.shape, (out.shape, ref.shape)
    err = float(jnp.max(jnp.abs(out.astype(jnp.float32) - ref)))
    assert jnp.allclose(out.astype(jnp.float32), ref, atol=atol, rtol=rtol), err
    return out.shape


if __name__ == "__main__":
    key = jax.random.PRNGKey(0)

    # Small deterministic config (all channels equal, as required by torch.cat dim=-1).
    # L_out: 16 (k=3,s=1,p=1) and 8 (k=5,s=2,p=2) -> (2, 8*(16+8)) = (2, 192)
    shape1 = _run_case(key, B=2, T=16, d_model=8, channels=[8, 8],
                       kernel_sizes=[3, 5], strides=[1, 2], paddings=[1, 2])
    assert shape1 == (2, 8 * (16 + 8)), shape1

    # Longer sequence: exercises the >1 L-tile path and batch-row folding.
    _run_case(key, B=2, T=400, d_model=8, channels=[8, 8],
              kernel_sizes=[3, 5], strides=[1, 2], paddings=[1, 2])

    # bf16 MXU path (f32 accumulation); looser tolerance against the f32 reference.
    _run_case(key, B=2, T=64, d_model=8, channels=[8, 8],
              kernel_sizes=[3, 5], strides=[1, 2], paddings=[1, 2],
              compute_dtype=jnp.bfloat16, atol=5e-2, rtol=5e-2)

    print("KERNEL_OK")
</pallas_src>

<mosaic_0001>
module attributes {stable_mosaic.version = 11 : i64} {
  func.func @_conv_block_kernel(%arg0: i32, %arg1: i32, %arg2: memref<1x272x8xf32, #tpu.memory_space<vmem>>, %arg3: memref<5x8x8xf32, #tpu.memory_space<vmem>>, %arg4: memref<8x1xf32, #tpu.memory_space<vmem>>, %arg5: memref<1x8x128xf32, #tpu.memory_space<vmem>>) attributes {dimension_semantics = [#tpu.dimension_semantics<parallel>, #tpu.dimension_semantics<parallel>], iteration_bounds = array<i64: 2, 1>, scalar_prefetch = 0 : i64, scratch_operands = 0 : i64, tpu.core_type = #tpu.core_type<tc>, window_params = [{transform_indices = @transform_0, window_bounds = array<i64: 1, 272, 8>}, {pipeline_mode = #tpu.pipeline_mode<synchronous>, transform_indices = @transform_1, window_bounds = array<i64: 5, 8, 8>}, {pipeline_mode = #tpu.pipeline_mode<synchronous>, transform_indices = @transform_2, window_bounds = array<i64: 8, 1>}, {transform_indices = @transform_3, window_bounds = array<i64: 1, 8, 128>}]} {
    %c128_i32 = arith.constant 128 : i32
    %0 = arith.muli %arg1, %c128_i32 : i32
    %1 = tpu.assume_multiple %0, 128 : i32
    %c0 = arith.constant 0 : index
    %c0_0 = arith.constant 0 : index
    %2 = vector.load %arg4[%c0, %c0_0] : memref<8x1xf32, #tpu.memory_space<vmem>>, vector<8x1xf32>
    %c0_i32 = arith.constant 0 : i32
    %3 = arith.addi %c0_i32, %1 : i32
    %c0_1 = arith.constant 0 : index
    %4 = arith.index_cast %3 : i32 to index
    %c0_2 = arith.constant 0 : index
    %5 = vector.load %arg2[%c0_1, %4, %c0_2] : memref<1x272x8xf32, #tpu.memory_space<vmem>>, vector<1x128x8xf32>
    %6 = vector.shape_cast %5 : vector<1x128x8xf32> to vector<128x8xf32>
    %c0_3 = arith.constant 0 : index
    %c0_4 = arith.constant 0 : index
    %c0_5 = arith.constant 0 : index
    %7 = vector.load %arg3[%c0_3, %c0_4, %c0_5] : memref<5x8x8xf32, #tpu.memory_space<vmem>>, vector<1x8x8xf32>
    %8 = vector.shape_cast %7 : vector<1x8x8xf32> to vector<8x8xf32>
    %cst = arith.constant dense<0.000000e+00> : vector<8x128xf32>
    %9 = tpu.matmul %8, %6, %cst {dimension_numbers = #tpu.dot_dimension_numbers<[1], [1], [0], [0], [0, 0, 1, 0], [], []>} : vector<8x8xf32>, vector<128x8xf32>, vector<8x128xf32> -> vector<8x128xf32>
    %c136_i32 = arith.constant 136 : i32
    %10 = arith.addi %c136_i32, %1 : i32
    %c0_6 = arith.constant 0 : index
    %11 = arith.index_cast %10 : i32 to index
    %c0_7 = arith.constant 0 : index
    %12 = vector.load %arg2[%c0_6, %11, %c0_7] : memref<1x272x8xf32, #tpu.memory_space<vmem>>, vector<1x128x8xf32>
    %13 = vector.shape_cast %12 : vector<1x128x8xf32> to vector<128x8xf32>
    %c1 = arith.constant 1 : index
    %c0_8 = arith.constant 0 : index
    %c0_9 = arith.constant 0 : index
    %14 = vector.load %arg3[%c1, %c0_8, %c0_9] : memref<5x8x8xf32, #tpu.memory_space<vmem>>, vector<1x8x8xf32>
    %15 = vector.shape_cast %14 : vector<1x8x8xf32> to vector<8x8xf32>
    %cst_10 = arith.constant dense<0.000000e+00> : vector<8x128xf32>
    %16 = tpu.matmul %15, %13, %cst_10 {dimension_numbers = #tpu.dot_dimension_numbers<[1], [1], [0], [0], [0, 0, 1, 0], [], []>} : vector<8x8xf32>, vector<128x8xf32>, vector<8x128xf32> -> vector<8x128xf32>
    %17 = arith.addf %9, %16 : vector<8x128xf32>
    %c1_i32 = arith.constant 1 : i32
    %18 = arith.addi %c1_i32, %1 : i32
    %c0_11 = arith.constant 0 : index
    %19 = arith.index_cast %18 : i32 to index
    %c0_12 = arith.constant 0 : index
    %20 = vector.load %arg2[%c0_11, %19, %c0_12] : memref<1x272x8xf32, #tpu.memory_space<vmem>>, vector<1x128x8xf32>
    %21 = vector.shape_cast %20 : vector<1x128x8xf32> to vector<128x8xf32>
    %c2 = arith.constant 2 : index
    %c0_13 = arith.constant 0 : index
    %c0_14 = arith.constant 0 : index
    %22 = vector.load %arg3[%c2, %c0_13, %c0_14] : memref<5x8x8xf32, #tpu.memory_space<vmem>>, vector<1x8x8xf32>
    %23 = vector.shape_cast %22 : vector<1x8x8xf32> to vector<8x8xf32>
    %cst_15 = arith.constant dense<0.000000e+00> : vector<8x128xf32>
    %24 = tpu.matmul %23, %21, %cst_15 {dimension_numbers = #tpu.dot_dimension_numbers<[1], [1], [0], [0], [0, 0, 1, 0], [], []>} : vector<8x8xf32>, vector<128x8xf32>, vector<8x128xf32> -> vector<8x128xf32>
    %25 = arith.addf %17, %24 : vector<8x128xf32>
    %c137_i32 = arith.constant 137 : i32
    %26 = arith.addi %c137_i32, %1 : i32
    %c0_16 = arith.constant 0 : index
    %27 = arith.index_cast %26 : i32 to index
    %c0_17 = arith.constant 0 : index
    %28 = vector.load %arg2[%c0_16, %27, %c0_17] : memref<1x272x8xf32, #tpu.memory_space<vmem>>, vector<1x128x8xf32>
    %29 = vector.shape_cast %28 : vector<1x128x8xf32> to vector<128x8xf32>
    %c3 = arith.constant 3 : index
    %c0_18 = arith.constant 0 : index
    %c0_19 = arith.constant 0 : index
    %30 = vector.load %arg3[%c3, %c0_18, %c0_19] : memref<5x8x8xf32, #tpu.memory_space<vmem>>, vector<1x8x8xf32>
    %31 = vector.shape_cast %30 : vector<1x8x8xf32> to vector<8x8xf32>
    %cst_20 = arith.constant dense<0.000000e+00> : vector<8x128xf32>
    %32 = tpu.matmul %31, %29, %cst_20 {dimension_numbers = #tpu.dot_dimension_numbers<[1], [1], [0], [0], [0, 0, 1, 0], [], []>} : vector<8x8xf32>, vector<128x8xf32>, vector<8x128xf32> -> vector<8x128xf32>
    %33 = arith.addf %25, %32 : vector<8x128xf32>
    %c2_i32 = arith.constant 2 : i32
    %34 = arith.addi %c2_i32, %1 : i32
    %c0_21 = arith.constant 0 : index
    %35 = arith.index_cast %34 : i32 to index
    %c0_22 = arith.constant 0 : index
    %36 = vector.load %arg2[%c0_21, %35, %c0_22] : memref<1x272x8xf32, #tpu.memory_space<vmem>>, vector<1x128x8xf32>
    %37 = vector.shape_cast %36 : vector<1x128x8xf32> to vector<128x8xf32>
    %c4 = arith.constant 4 : index
    %c0_23 = arith.constant 0 : index
    %c0_24 = arith.constant 0 : index
    %38 = vector.load %arg3[%c4, %c0_23, %c0_24] : memref<5x8x8xf32, #tpu.memory_space<vmem>>, vector<1x8x8xf32>
    %39 = vector.shape_cast %38 : vector<1x8x8xf32> to vector<8x8xf32>
    %cst_25 = arith.constant dense<0.000000e+00> : vector<8x128xf32>
    %40 = tpu.matmul %39, %37, %cst_25 {dimension_numbers = #tpu.dot_dimension_numbers<[1], [1], [0], [0], [0, 0, 1, 0], [], []>} : vector<8x8xf32>, vector<128x8xf32>, vector<8x128xf32> -> vector<8x128xf32>
    %41 = arith.addf %33, %40 : vector<8x128xf32>
    %42 = vector.broadcast %2 : vector<8x1xf32> to vector<8x128xf32>
    %43 = arith.addf %41, %42 : vector<8x128xf32>
    %cst_26 = arith.constant 0.000000e+00 : f32
    %44 = vector.broadcast %cst_26 : f32 to vector<8x128xf32>
    %45 = arith.maximumf %43, %44 : vector<8x128xf32>
    %c0_27 = arith.constant 0 : index
    %c0_28 = arith.constant 0 : index
    %c0_29 = arith.constant 0 : index
    %46 = vector.load %arg5[%c0_27, %c0_28, %c0_29] : memref<1x8x128xf32, #tpu.memory_space<vmem>>, vector<1x8x128xf32>
    %47 = vector.shape_cast %46 : vector<1x8x128xf32> to vector<8x128xf32>
    %48 = vector.shape_cast %45 : vector<8x128xf32> to vector<1x8x128xf32>
    tpu.vector_store %arg5[%c0_27, %c0_28, %c0_29], %48 {strides = array<i32>} : memref<1x8x128xf32, #tpu.memory_space<vmem>>, vector<1x8x128xf32>,
    return
  }
  func.func @transform_0(%arg0: i32, %arg1: i32) -> (i32, i32, i32) {
    %c0_i32 = arith.constant 0 : i32
    %c0_i32_0 = arith.constant 0 : i32
    %c0_i32_1 = arith.constant 0 : i32
    return %arg0, %c0_i32, %c0_i32_0 : i32, i32, i32
  }
  func.func @transform_1(%arg0: i32, %arg1: i32) -> (i32, i32, i32) {
    %c0_i32 = arith.constant 0 : i32
    %c0_i32_0 = arith.constant 0 : i32
    %c0_i32_1 = arith.constant 0 : i32
    %c0_i32_2 = arith.constant 0 : i32
    return %c0_i32, %c0_i32_0, %c0_i32_1 : i32, i32, i32
  }
  func.func @transform_2(%arg0: i32, %arg1: i32) -> (i32, i32) {
    %c0_i32 = arith.constant 0 : i32
    %c0_i32_0 = arith.constant 0 : i32
    %c0_i32_1 = arith.constant 0 : i32
    return %c0_i32, %c0_i32_0 : i32, i32
  }
  func.func @transform_3(%arg0: i32, %arg1: i32) -> (i32, i32, i32) {
    %c0_i32 = arith.constant 0 : i32
    %c0_i32_0 = arith.constant 0 : i32
    return %arg0, %c0_i32, %arg1 : i32, i32, i32
  }
}

module attributes {stable_mosaic.version = 11 : i64} {
  func.func @_conv_block_kernel(%arg0: i32, %arg1: i32, %arg2: memref<1x136x8xf32, #tpu.memory_space<vmem>>, %arg3: memref<3x8x8xf32, #tpu.memory_space<vmem>>, %arg4: memref<8x1xf32, #tpu.memory_space<vmem>>, %arg5: memref<1x8x128xf32, #tpu.memory_space<vmem>>) attributes {dimension_semantics = [#tpu.dimension_semantics<parallel>, #tpu.dimension_semantics<parallel>], iteration_bounds = array<i64: 2, 1>, scalar_prefetch = 0 : i64, scratch_operands = 0 : i64, tpu.core_type = #tpu.core_type<tc>, window_params = [{transform_indices = @transform_0, window_bounds = array<i64: 1, 136, 8>}, {pipeline_mode = #tpu.pipeline_mode<synchronous>, transform_indices = @transform_1, window_bounds = array<i64: 3, 8, 8>}, {pipeline_mode = #tpu.pipeline_mode<synchronous>, transform_indices = @transform_2, window_bounds = array<i64: 8, 1>}, {transform_indices = @transform_3, window_bounds = array<i64: 1, 8, 128>}]} {
    %c128_i32 = arith.constant 128 : i32
    %0 = arith.muli %arg1, %c128_i32 : i32
    %1 = tpu.assume_multiple %0, 128 : i32
    %c0 = arith.constant 0 : index
    %c0_0 = arith.constant 0 : index
    %2 = vector.load %arg4[%c0, %c0_0] : memref<8x1xf32, #tpu.memory_space<vmem>>, vector<8x1xf32>
    %c0_i32 = arith.constant 0 : i32
    %3 = arith.addi %c0_i32, %1 : i32
    %c0_1 = arith.constant 0 : index
    %4 = arith.index_cast %3 : i32 to index
    %c0_2 = arith.constant 0 : index
    %5 = vector.load %arg2[%c0_1, %4, %c0_2] : memref<1x136x8xf32, #tpu.memory_space<vmem>>, vector<1x128x8xf32>
    %6 = vector.shape_cast %5 : vector<1x128x8xf32> to vector<128x8xf32>
    %c0_3 = arith.constant 0 : index
    %c0_4 = arith.constant 0 : index
    %c0_5 = arith.constant 0 : index
    %7 = vector.load %arg3[%c0_3, %c0_4, %c0_5] : memref<3x8x8xf32, #tpu.memory_space<vmem>>, vector<1x8x8xf32>
    %8 = vector.shape_cast %7 : vector<1x8x8xf32> to vector<8x8xf32>
    %cst = arith.constant dense<0.000000e+00> : vector<8x128xf32>
    %9 = tpu.matmul %8, %6, %cst {dimension_numbers = #tpu.dot_dimension_numbers<[1], [1], [0], [0], [0, 0, 1, 0], [], []>} : vector<8x8xf32>, vector<128x8xf32>, vector<8x128xf32> -> vector<8x128xf32>
    %c1_i32 = arith.constant 1 : i32
    %10 = arith.addi %c1_i32, %1 : i32
    %c0_6 = arith.constant 0 : index
    %11 = arith.index_cast %10 : i32 to index
    %c0_7 = arith.constant 0 : index
    %12 = vector.load %arg2[%c0_6, %11, %c0_7] : memref<1x136x8xf32, #tpu.memory_space<vmem>>, vector<1x128x8xf32>
    %13 = vector.shape_cast %12 : vector<1x128x8xf32> to vector<128x8xf32>
    %c1 = arith.constant 1 : index
    %c0_8 = arith.constant 0 : index
    %c0_9 = arith.constant 0 : index
    %14 = vector.load %arg3[%c1, %c0_8, %c0_9] : memref<3x8x8xf32, #tpu.memory_space<vmem>>, vector<1x8x8xf32>
    %15 = vector.shape_cast %14 : vector<1x8x8xf32> to vector<8x8xf32>
    %cst_10 = arith.constant dense<0.000000e+00> : vector<8x128xf32>
    %16 = tpu.matmul %15, %13, %cst_10 {dimension_numbers = #tpu.dot_dimension_numbers<[1], [1], [0], [0], [0, 0, 1, 0], [], []>} : vector<8x8xf32>, vector<128x8xf32>, vector<8x128xf32> -> vector<8x128xf32>
    %17 = arith.addf %9, %16 : vector<8x128xf32>
    %c2_i32 = arith.constant 2 : i32
    %18 = arith.addi %c2_i32, %1 : i32
    %c0_11 = arith.constant 0 : index
    %19 = arith.index_cast %18 : i32 to index
    %c0_12 = arith.constant 0 : index
    %20 = vector.load %arg2[%c0_11, %19, %c0_12] : memref<1x136x8xf32, #tpu.memory_space<vmem>>, vector<1x128x8xf32>
    %21 = vector.shape_cast %20 : vector<1x128x8xf32> to vector<128x8xf32>
    %c2 = arith.constant 2 : index
    %c0_13 = arith.constant 0 : index
    %c0_14 = arith.constant 0 : index
    %22 = vector.load %arg3[%c2, %c0_13, %c0_14] : memref<3x8x8xf32, #tpu.memory_space<vmem>>, vector<1x8x8xf32>
    %23 = vector.shape_cast %22 : vector<1x8x8xf32> to vector<8x8xf32>
    %cst_15 = arith.constant dense<0.000000e+00> : vector<8x128xf32>
    %24 = tpu.matmul %23, %21, %cst_15 {dimension_numbers = #tpu.dot_dimension_numbers<[1], [1], [0], [0], [0, 0, 1, 0], [], []>} : vector<8x8xf32>, vector<128x8xf32>, vector<8x128xf32> -> vector<8x128xf32>
    %25 = arith.addf %17, %24 : vector<8x128xf32>
    %26 = vector.broadcast %2 : vector<8x1xf32> to vector<8x128xf32>
    %27 = arith.addf %25, %26 : vector<8x128xf32>
    %cst_16 = arith.constant 0.000000e+00 : f32
    %28 = vector.broadcast %cst_16 : f32 to vector<8x128xf32>
    %29 = arith.maximumf %27, %28 : vector<8x128xf32>
    %c0_17 = arith.constant 0 : index
    %c0_18 = arith.constant 0 : index
    %c0_19 = arith.constant 0 : index
    %30 = vector.load %arg5[%c0_17, %c0_18, %c0_19] : memref<1x8x128xf32, #tpu.memory_space<vmem>>, vector<1x8x128xf32>
    %31 = vector.shape_cast %30 : vector<1x8x128xf32> to vector<8x128xf32>
    %32 = vector.shape_cast %29 : vector<8x128xf32> to vector<1x8x128xf32>
    tpu.vector_store %arg5[%c0_17, %c0_18, %c0_19], %32 {strides = array<i32>} : memref<1x8x128xf32, #tpu.memory_space<vmem>>, vector<1x8x128xf32>,
    return
  }
  func.func @transform_0(%arg0: i32, %arg1: i32) -> (i32, i32, i32) {
    %c0_i32 = arith.constant 0 : i32
    %c0_i32_0 = arith.constant 0 : i32
    %c0_i32_1 = arith.constant 0 : i32
    return %arg0, %c0_i32, %c0_i32_0 : i32, i32, i32
  }
  func.func @transform_1(%arg0: i32, %arg1: i32) -> (i32, i32, i32) {
    %c0_i32 = arith.constant 0 : i32
    %c0_i32_0 = arith.constant 0 : i32
    %c0_i32_1 = arith.constant 0 : i32
    %c0_i32_2 = arith.constant 0 : i32
    return %c0_i32, %c0_i32_0, %c0_i32_1 : i32, i32, i32
  }
  func.func @transform_2(%arg0: i32, %arg1: i32) -> (i32, i32) {
    %c0_i32 = arith.constant 0 : i32
    %c0_i32_0 = arith.constant 0 : i32
    %c0_i32_1 = arith.constant 0 : i32
    return %c0_i32, %c0_i32_0 : i32, i32
  }
  func.func @transform_3(%arg0: i32, %arg1: i32) -> (i32, i32, i32) {
    %c0_i32 = arith.constant 0 : i32
    %c0_i32_0 = arith.constant 0 : i32
    return %arg0, %c0_i32, %arg1 : i32, i32, i32
  }
}

</mosaic_0001>

<bundles_post_ra>
// kernel: _lambda_.2
= control target key start
LH: loop header
LB: loop body
LE: loop exit
PB: predicated region body
PF: predicated region fallthrough
CT: control target
= control target key end

     0   :  { %s1125_s12 = smov 0   ;;  %s1127_s13 = smov 0   ;;  %s1311_s0 = inlined_call_operand.vmem [shape: f32[2,136,8], index: 0, kind: input, shape index: {}]   ;;  %s1312_s1 = inlined_call_operand.vmem [shape: f32[3,8,8], index: 1, kind: input, shape index: {}]   ;;  %s1313_s2 = inlined_call_operand.vmem [shape: f32[8,1], index: 2, kind: input, shape index: {}]   ;;  %s1314_s3 = inlined_call_operand.vmem [shape: f32[2,8,128], index: 3, kind: output, shape index: {}]  }
   0x1   :  { %s1129_s14 = smov 0  }
   0x2 LB: > { %s25_s15 = sadd.s32 1, %s1095_s13  ;;  %p705_p0 = scmp.ge.s32.totalorder %s1099_s14, 1  ;;  %s1099_s14 = sphi %s1129_s14, %s13_s14   ;;  %s1095_s13 = sphi %s1127_s13, %s1318_s13   ;;  %s1091_s12 = sphi %s1125_s12, %s1317_s12  }
   0x3   : > { %p27_p1 = scmp.ge.s32.totalorder %s25_s15, 2  ;;  %p151_p2 = scmp.lt.s32.totalorder %s1099_s14, 3 }
   0x5   : > { %s1320_s15 = smov (%p27_p1, %s25_s15), 0  ;;  %p152_p3 = pnand %p705_p0, %p151_p2 }
   0x6   : > { %p177_p4 = scmp.lt.s32.totalorder (!%p152_p3), %s1091_s12, 1  ;;  %v1101_v0 = vmov (!%p152_p3), 0.0|0.0   ;;  %vm1102_vm0 = vmmov (!%p152_p3), 0   ;;  %v1103_v1 = vmov (!%p152_p3), 0.0   ;;  %vm229_vm1 = vcmask (!%p152_p3), 64512   ;;  %v190_v22 = vld [vmem:[%s1313_s2] sm:$0xff] (!%p152_p3) }
   0x7   : > { %155 = sbr.rel (%p152_p3) target bundleno = 367 (0x16f), region = 32  ;;  %951 = vmatprep.subr.bf16.mxu0 (!%p152_p3), %v1101_v0  ;;  %983 = vmatprep.subr.bf16.mxu1 (!%p152_p3), %v1101_v0  ;;  %vm1159_vm2 = vmpackc.low (!%p152_p3), %vm229_vm1, %vm229_vm1  ;;  %v1104_v9 = vmov (!%p152_p3), 0   ;;  %v724_v55 = vld [vmem:[%s1312_s1 + $0x8] sm:$0xff] (!%p152_p3)  ;;  %v208_v57 = vld [vmem:[%s1312_s1] sm:$0xff] (!%p152_p3) }
   0x8   : > { %878 = vmatprep.mubr.msk.f32.mxu0 (!%p152_p3), %vm1102_vm0, %v1103_v1  ;;  %913 = vmatprep.mubr.msk.f32.mxu1 (!%p152_p3), %vm1102_vm0, %v1103_v1 }
   0x9   : > { %1076 = vset.pattern.permute.xlu0 (!%p152_p3), %v1104_v9 }
   0xa   : > { %616 = vperm.xlu0 (!%p152_p3), %1076, %v190_v22  }
   0xe   : > { %s1322_s12 = smov (!%p177_p4, %s1091_s12), 1 }
   0xf   : > { %s1047_s16 = smul.u32 136, %s1322_s12  ;;  %s707_s28 = sshll.u32 %s1322_s12, 3 }
  0x10   : > { %s188_s4 = scalar_lea.vmem %s1314_s3, %s707_s28 }
  0x11   : > { %s1155_s19 = scalar_lea.vmem %s1311_s0, %s1047_s16 }
  0x12   : > { %v708_v3 = vld [vmem:[%s1155_s19 + $0x1] sm:$0xff]  ;;  %v709_v4 = vld [vmem:[%s1155_s19 + $0x9] sm:$0xff]  ;;  %v710_v10 = vld [vmem:[%s1155_s19 + $0x11] sm:$0xff] }
  0x13   : > { %v192_v5 = vld [vmem:[%s1155_s19] sm:$0xff]  ;;  %v952_v6 = vpack.c.bf16 %v709_v4, %v708_v3  ;;  %v193_v7 = vld [vmem:[%s1155_s19 + $0x8] sm:$0xff]  ;;  %v194_v12 = vld [vmem:[%s1155_s19 + $0x10] sm:$0xff] }
  0x14   : > { %v984_v8 = vpack.c.bf16 %v193_v7, %v192_v5  ;;  %v711_v11 = vld [vmem:[%s1155_s19 + $0x19] sm:$0xff]  ;;  %v712_v16 = vld [vmem:[%s1155_s19 + $0x21] sm:$0xff]  ;;  %v713_v17 = vld [vmem:[%s1155_s19 + $0x29] sm:$0xff] }
  0x15   : > { %954 = vmatpush3.bf16.xpose.msk.msra.mxu0 %vm1159_vm2, %v952_v6  ;;  %v195_v13 = vld [vmem:[%s1155_s19 + $0x18] sm:$0xff]  ;;  %v956_v14 = vpack.c.bf16 %v711_v11, %v710_v10  ;;  %v196_v18 = vld [vmem:[%s1155_s19 + $0x20] sm:$0xff]  ;;  %v197_v19 = vld [vmem:[%s1155_s19 + $0x28] sm:$0xff]  ;;  %v960_v20 = vpack.c.bf16 %v713_v17, %v712_v16 }
  0x16   : > { %986 = vmatpush3.bf16.xpose.msk.msra.mxu1 %vm1159_vm2, %v984_v8  ;;  %955 = vmatprep.subr.bf16.mxu0 %v1101_v0  ;;  %v988_v15 = vpack.c.bf16 %v195_v13, %v194_v12  ;;  %v992_v21 = vpack.c.bf16 %v197_v19, %v196_v18  ;;  %v714_v23 = vld [vmem:[%s1155_s19 + $0x31] sm:$0xff]  ;;  %v715_v24 = vld [vmem:[%s1155_s19 + $0x39] sm:$0xff]  ;;  %v716_v29 = vld [vmem:[%s1155_s19 + $0x41] sm:$0xff] }
  0x17   : > { %987 = vmatprep.subr.bf16.mxu1 %v1101_v0  ;;  %v198_v25 = vld [vmem:[%s1155_s19 + $0x30] sm:$0xff]  ;;  %v199_v26 = vld [vmem:[%s1155_s19 + $0x38] sm:$0xff]  ;;  %v964_v27 = vpack.c.bf16 %v715_v24, %v714_v23  ;;  %v200_v31 = vld [vmem:[%s1155_s19 + $0x40] sm:$0xff] }
  0x18   : > { %v996_v28 = vpack.c.bf16 %v199_v26, %v198_v25  ;;  %v717_v30 = vld [vmem:[%s1155_s19 + $0x49] sm:$0xff]  ;;  %v718_v35 = vld [vmem:[%s1155_s19 + $0x51] sm:$0xff]  ;;  %v719_v36 = vld [vmem:[%s1155_s19 + $0x59] sm:$0xff] }
  0x19   : > { %v201_v32 = vld [vmem:[%s1155_s19 + $0x48] sm:$0xff]  ;;  %v968_v33 = vpack.c.bf16 %v717_v30, %v716_v29  ;;  %v202_v37 = vld [vmem:[%s1155_s19 + $0x50] sm:$0xff]  ;;  %v203_v38 = vld [vmem:[%s1155_s19 + $0x58] sm:$0xff]  ;;  %v972_v39 = vpack.c.bf16 %v719_v36, %v718_v35 }
  0x1a   : > { %v1000_v34 = vpack.c.bf16 %v201_v32, %v200_v31  ;;  %v1004_v40 = vpack.c.bf16 %v203_v38, %v202_v37  ;;  %v720_v41 = vld [vmem:[%s1155_s19 + $0x61] sm:$0xff]  ;;  %v721_v42 = vld [vmem:[%s1155_s19 + $0x69] sm:$0xff]  ;;  %v722_v47 = vld [vmem:[%s1155_s19 + $0x71] sm:$0xff] }
  0x1b   : > { %v204_v43 = vld [vmem:[%s1155_s19 + $0x60] sm:$0xff]  ;;  %v205_v44 = vld [vmem:[%s1155_s19 + $0x68] sm:$0xff]  ;;  %v976_v45 = vpack.c.bf16 %v721_v42, %v720_v41  ;;  %v206_v49 = vld [vmem:[%s1155_s19 + $0x70] sm:$0xff] }
  0x1c   : > { %v1008_v46 = vpack.c.bf16 %v205_v44, %v204_v43  ;;  %v723_v48 = vld [vmem:[%s1155_s19 + $0x79] sm:$0xff]  ;;  %v759_v53 = vld [vmem:[%s1155_s19 + $0x2] sm:$0xff]  ;;  %v760_v54 = vld [vmem:[%s1155_s19 + $0xa] sm:$0xff] }
  0x1d   : > { %958 = vmatpush3.bf16.xpose.msk.msra.mxu0 %vm1159_vm2, %v956_v14  ;;  %v207_v50 = vld [vmem:[%s1155_s19 + $0x78] sm:$0xff]  ;;  %v980_v51 = vpack.c.bf16 %v723_v48, %v722_v47  ;;  %v1016_v56 = vpack.c.bf16 %v760_v54, %v759_v53  ;;  %v763_v61 = vld [vmem:[%s1155_s19 + $0x22] sm:$0xff]  ;;  %v764_v62 = vld [vmem:[%s1155_s19 + $0x2a] sm:$0xff] }
  0x1e   : > { %990 = vmatpush3.bf16.xpose.msk.msra.mxu1 %vm1159_vm2, %v988_v15  ;;  %959 = vmatprep.subr.bf16.mxu0 %v1101_v0  ;;  %v1012_v52 = vpack.c.bf16 %v207_v50, %v206_v49  ;;  %v761_v58 = vld [vmem:[%s1155_s19 + $0x12] sm:$0xff]  ;;  %v762_v59 = vld [vmem:[%s1155_s19 + $0x1a] sm:$0xff]  ;;  %v1024_v63 = vpack.c.bf16 %v764_v62, %v763_v61  ;;  %v767_v5 = vld [vmem:[%s1155_s19 + $0x42] sm:$0xff] }
  0x1f   : > { %991 = vmatprep.subr.bf16.mxu1 %v1101_v0  ;;  %v1020_v60 = vpack.c.bf16 %v762_v59, %v761_v58  ;;  %v765_v3 = vld [vmem:[%s1155_s19 + $0x32] sm:$0xff]  ;;  %v768_v6 = vld [vmem:[%s1155_s19 + $0x4a] sm:$0xff]  ;;  %v770_v9 = vld [vmem:[%s1155_s19 + $0x5a] sm:$0xff] }
  0x20   : > { %v1032_v7 = vpack.c.bf16 %v768_v6, %v767_v5  ;;  %v769_v8 = vld [vmem:[%s1155_s19 + $0x52] sm:$0xff]  ;;  %v771_v11 = vld [vmem:[%s1155_s19 + $0x62] sm:$0xff]  ;;  %v772_v12 = vld [vmem:[%s1155_s19 + $0x6a] sm:$0xff] }
  0x21   : > { %v1036_v10 = vpack.c.bf16 %v770_v9, %v769_v8  ;;  %v1040_v13 = vpack.c.bf16 %v772_v12, %v771_v11  ;;  %v773_v14 = vld [vmem:[%s1155_s19 + $0x72] sm:$0xff]  ;;  %v774_v15 = vld [vmem:[%s1155_s19 + $0x7a] sm:$0xff] }
  0x22   : > { %v1044_v16 = vpack.c.bf16 %v774_v15, %v773_v14  ;;  %v775_v17 = vld [vmem:[%s1312_s1 + $0x10] sm:$0xff] }
  0x25   : > { %962 = vmatpush3.bf16.xpose.msk.msra.mxu0 %vm1159_vm2, %v960_v20 }
  0x26   : > { %994 = vmatpush3.bf16.xpose.msk.msra.mxu1 %vm1159_vm2, %v992_v21  ;;  %963 = vmatprep.subr.bf16.mxu0 %v1101_v0 }
  0x27   : > { %995 = vmatprep.subr.bf16.mxu1 %v1101_v0 }
  0x2d   : > { %966 = vmatpush3.bf16.xpose.msk.msra.mxu0 %vm1159_vm2, %v964_v27 }
  0x2e   : > { %998 = vmatpush3.bf16.xpose.msk.msra.mxu1 %vm1159_vm2, %v996_v28  ;;  %967 = vmatprep.subr.bf16.mxu0 %v1101_v0 }
  0x2f   : > { %999 = vmatprep.subr.bf16.mxu1 %v1101_v0 }
  0x35   : > { %970 = vmatpush3.bf16.xpose.msk.msra.mxu0 %vm1159_vm2, %v968_v33 }
  0x36   : > { %1002 = vmatpush3.bf16.xpose.msk.msra.mxu1 %vm1159_vm2, %v1000_v34  ;;  %971 = vmatprep.subr.bf16.mxu0 %v1101_v0 }
  0x37   : > { %1003 = vmatprep.subr.bf16.mxu1 %v1101_v0 }
  0x3d   : > { %974 = vmatpush3.bf16.xpose.msk.msra.mxu0 %vm1159_vm2, %v972_v39 }
  0x3e   : > { %1006 = vmatpush3.bf16.xpose.msk.msra.mxu1 %vm1159_vm2, %v1004_v40  ;;  %975 = vmatprep.subr.bf16.mxu0 %v1101_v0 }
  0x3f   : > { %1007 = vmatprep.subr.bf16.mxu1 %v1101_v0 }
  0x45   : > { %978 = vmatpush3.bf16.xpose.msk.msra.mxu0 %vm1159_vm2, %v976_v45 }
  0x46   : > { %1010 = vmatpush3.bf16.xpose.msk.msra.mxu1 %vm1159_vm2, %v1008_v46  ;;  %979 = vmatprep.subr.bf16.mxu0 %v1101_v0 }
  0x47   : > { %1011 = vmatprep.subr.bf16.mxu1 %v1101_v0 }
  0x4d   : > { %982 = vmatpush3.bf16.xpose.msk.msra.mxu0 %vm1159_vm2, %v980_v51 }
  0x4e   : > { %1014 = vmatpush3.bf16.xpose.msk.msra.mxu1 %vm1159_vm2, %v1012_v52  ;;  %1015 = vmatprep.subr.bf16.mxu0 %v1101_v0 }
  0x54   : > { %879 = vmatmul.mubr.msk.f32.vlgmr.msra.gmra.mrb[0].mxu0 %vm229_vm1, %v724_v55 }
  0x55   : > { %914 = vmatmul.mubr.msk.f32.vlgmr.msra.gmra.mrb[0].mxu1 %vm229_vm1, %v208_v57  ;;  %1018 = vmatpush3.bf16.xpose.msk.msra.mxu0 %vm1159_vm2, %v1016_v56 }
  0x56   : > { %1019 = vmatprep.subr.bf16.mxu0 %v1101_v0  ;;  %948 = vmatprep.mubr.msk.f32.mxu0 %vm1102_vm0, %v1103_v1  ;;  %v766_v1 = vld [vmem:[%s1155_s19 + $0x3a] sm:$0xff] }
  0x57   : > { %v1028_v4 = vpack.c.bf16 %v766_v1, %v765_v3 }
  0x5d   : > { %1022 = vmatpush3.bf16.xpose.msk.msra.mxu0 %vm1159_vm2, %v1020_v60 }
  0x5e   : > { %1023 = vmatprep.subr.bf16.mxu0 %v1101_v0 }
  0x65   : > { %1026 = vmatpush3.bf16.xpose.msk.msra.mxu0 %vm1159_vm2, %v1024_v63 }
  0x66   : > { %1027 = vmatprep.subr.bf16.mxu0 %v1101_v0 }
  0x6d   : > { %1030 = vmatpush3.bf16.xpose.msk.msra.mxu0 %vm1159_vm2, %v1028_v4 }
  0x6e   : > { %1031 = vmatprep.subr.bf16.mxu0 %v1101_v0 }
  0x75   : > { %1034 = vmatpush3.bf16.xpose.msk.msra.mxu0 %vm1159_vm2, %v1032_v7 }
  0x76   : > { %1035 = vmatprep.subr.bf16.mxu0 %v1101_v0 }
  0x7d   : > { %1038 = vmatpush3.bf16.xpose.msk.msra.mxu0 %vm1159_vm2, %v1036_v10 }
  0x7e   : > { %1039 = vmatprep.subr.bf16.mxu0 %v1101_v0 }
  0x85   : > { %1042 = vmatpush3.bf16.xpose.msk.msra.mxu0 %vm1159_vm2, %v1040_v13 }
  0x86   : > { %1043 = vmatprep.subr.bf16.mxu0 %v1101_v0 }
  0x89   : > { %v617_v0 = vpop.permute.xlu0 %616 }
  0x8d   : > { %1046 = vmatpush3.bf16.xpose.msk.msra.mxu0 %vm1159_vm2, %v1044_v16 }
  0x94   : > { %949 = vmatmul.mubr.msk.f32.vlgmr.msra.gmra.mrb[2].mxu0 %vm229_vm1, %v775_v17 }
 0x127   : > { %v347_v18 = vpop.f32.mrb[0].mxu0 }
 0x128   : > { %v880_v19 = vpop.f32.mrb[1].mxu0  ;;  %v468_v20 = vpop.f32.mrb[0].mxu1 }
 0x129   : > { %v469_v21 = vadd.f32 %v468_v20, %v347_v18  ;;  %v915_v22 = vpop.f32.mrb[1].mxu1 }
 0x167   : > { %v609_v23 = vpop.f32.mrb[2].mxu0 }
 0x168   : > { %v613_v24 = vadd.f32 %v609_v23, %v469_v21  ;;  %v950_v25 = vpop.f32.mrb[3].mxu0 }
 0x16a   : > { %v619_v26 = vadd.f32 %v617_v0, %v613_v24 }
 0x16c   : > { %v620_v2 = vmax.f32 %v619_v26, 0.0 }
 0x16e   : > { %621 = vst [vmem:[%s188_s4] sm:$0xff] %v620_v2 }
 0x16f PF: > { %s13_s14 = sadd.s32 1, %s1099_s14   ;;  %s1317_s12 = smov %s1095_s13 }
 0x170   : > { %p10_p5 = scmp.ge.s32.totalorder %s13_s14, 4   ;;  %s1318_s13 = smov %s1320_s15 }
 0x172   :  { %12 = sbr.rel (!%p10_p5) target bundleno = 2 (0x2), region = 67 }

// kernel: _lambda_.3
= control target key start
LH: loop header
LB: loop body
LE: loop exit
PB: predicated region body
PF: predicated region fallthrough
CT: control target
= control target key end

     0   :  { %s1651_s12 = smov 0   ;;  %s1653_s13 = smov 0   ;;  %s1929_s0 = inlined_call_operand.vmem [shape: f32[2,272,8], index: 0, kind: input, shape index: {}]   ;;  %s1930_s1 = inlined_call_operand.vmem [shape: f32[5,8,8], index: 1, kind: input, shape index: {}]   ;;  %s1931_s2 = inlined_call_operand.vmem [shape: f32[8,1], index: 2, kind: input, shape index: {}]   ;;  %s1932_s3 = inlined_call_operand.vmem [shape: f32[2,8,128], index: 3, kind: output, shape index: {}]  }
   0x1   :  { %s1655_s14 = smov 0  }
   0x2 LB: > { %s25_s15 = sadd.s32 1, %s1621_s13  ;;  %p995_p0 = scmp.ge.s32.totalorder %s1625_s14, 1  ;;  %s1625_s14 = sphi %s1655_s14, %s13_s14   ;;  %s1621_s13 = sphi %s1653_s13, %s1936_s13   ;;  %s1617_s12 = sphi %s1651_s12, %s1935_s12  }
   0x3   : > { %p27_p1 = scmp.ge.s32.totalorder %s25_s15, 2  ;;  %p151_p2 = scmp.lt.s32.totalorder %s1625_s14, 3 }
   0x5   : > { %s1938_s15 = smov (%p27_p1, %s25_s15), 0  ;;  %p152_p3 = pnand %p995_p0, %p151_p2 }
   0x6   : > { %p177_p4 = scmp.lt.s32.totalorder (!%p152_p3), %s1617_s12, 1  ;;  %v1627_v0 = vmov (!%p152_p3), 0.0|0.0   ;;  %vm1628_vm0 = vmmov (!%p152_p3), 0   ;;  %v1629_v1 = vmov (!%p152_p3), 0.0   ;;  %vm229_vm1 = vcmask (!%p152_p3), 64512   ;;  %v1014_v55 = vld [vmem:[%s1930_s1 + $0x8] sm:$0xff] (!%p152_p3) }
   0x7   : > { %155 = sbr.rel (%p152_p3) target bundleno = 431 (0x1af), region = 32  ;;  %1413 = vmatprep.subr.bf16.mxu0 (!%p152_p3), %v1627_v0  ;;  %1445 = vmatprep.subr.bf16.mxu1 (!%p152_p3), %v1627_v0  ;;  %vm1685_vm2 = vmpackc.low (!%p152_p3), %vm229_vm1, %vm229_vm1  ;;  %v208_v57 = vld [vmem:[%s1930_s1] sm:$0xff] (!%p152_p3) }
   0x8   : > { %1270 = vmatprep.mubr.msk.f32.mxu0 (!%p152_p3), %vm1628_vm0, %v1629_v1  ;;  %1305 = vmatprep.mubr.msk.f32.mxu1 (!%p152_p3), %vm1628_vm0, %v1629_v1 }
   0xe   : > { %s1940_s12 = smov (!%p177_p4, %s1617_s12), 1 }
   0xf   : > { %s1573_s16 = smul.u32 272, %s1940_s12  ;;  %s997_s5 = sshll.u32 %s1940_s12, 3 }
  0x10   : > { %s188_s8 = scalar_lea.vmem %s1932_s3, %s997_s5 }
  0x11   : > { %s1681_s19 = scalar_lea.vmem %s1929_s0, %s1573_s16 }
  0x12   : > { %v998_v3 = vld [vmem:[%s1681_s19 + $0x88] sm:$0xff]  ;;  %v999_v4 = vld [vmem:[%s1681_s19 + $0x90] sm:$0xff]  ;;  %v192_v5 = vld [vmem:[%s1681_s19] sm:$0xff] }
  0x13   : > { %v1414_v6 = vpack.c.bf16 %v999_v4, %v998_v3  ;;  %v193_v7 = vld [vmem:[%s1681_s19 + $0x8] sm:$0xff]  ;;  %v1000_v9 = vld [vmem:[%s1681_s19 + $0x98] sm:$0xff]  ;;  %v1001_v10 = vld [vmem:[%s1681_s19 + $0xa0] sm:$0xff] }
  0x14   : > { %v1446_v8 = vpack.c.bf16 %v193_v7, %v192_v5  ;;  %v194_v11 = vld [vmem:[%s1681_s19 + $0x10] sm:$0xff]  ;;  %v195_v12 = vld [vmem:[%s1681_s19 + $0x18] sm:$0xff]  ;;  %v1418_v13 = vpack.c.bf16 %v1001_v10, %v1000_v9  ;;  %v1002_v15 = vld [vmem:[%s1681_s19 + $0xa8] sm:$0xff] }
  0x15   : > { %1416 = vmatpush3.bf16.xpose.msk.msra.mxu0 %vm1685_vm2, %v1414_v6  ;;  %v1450_v14 = vpack.c.bf16 %v195_v12, %v194_v11  ;;  %v1003_v16 = vld [vmem:[%s1681_s19 + $0xb0] sm:$0xff]  ;;  %v196_v17 = vld [vmem:[%s1681_s19 + $0x20] sm:$0xff]  ;;  %v197_v18 = vld [vmem:[%s1681_s19 + $0x28] sm:$0xff] }
  0x16   : > { %1448 = vmatpush3.bf16.xpose.msk.msra.mxu1 %vm1685_vm2, %v1446_v8  ;;  %1417 = vmatprep.subr.bf16.mxu0 %v1627_v0  ;;  %v1422_v19 = vpack.c.bf16 %v1003_v16, %v1002_v15  ;;  %v1454_v20 = vpack.c.bf16 %v197_v18, %v196_v17  ;;  %v1004_v21 = vld [vmem:[%s1681_s19 + $0xb8] sm:$0xff]  ;;  %v1005_v22 = vld [vmem:[%s1681_s19 + $0xc0] sm:$0xff]  ;;  %v198_v23 = vld [vmem:[%s1681_s19 + $0x30] sm:$0xff] }
  0x17   : > { %1449 = vmatprep.subr.bf16.mxu1 %v1627_v0  ;;  %v199_v24 = vld [vmem:[%s1681_s19 + $0x38] sm:$0xff]  ;;  %v1426_v25 = vpack.c.bf16 %v1005_v22, %v1004_v21  ;;  %v1006_v27 = vld [vmem:[%s1681_s19 + $0xc8] sm:$0xff]  ;;  %v1007_v28 = vld [vmem:[%s1681_s19 + $0xd0] sm:$0xff] }
  0x18   : > { %v1458_v26 = vpack.c.bf16 %v199_v24, %v198_v23  ;;  %v200_v29 = vld [vmem:[%s1681_s19 + $0x40] sm:$0xff]  ;;  %v201_v30 = vld [vmem:[%s1681_s19 + $0x48] sm:$0xff]  ;;  %v1430_v31 = vpack.c.bf16 %v1007_v28, %v1006_v27  ;;  %v1008_v33 = vld [vmem:[%s1681_s19 + $0xd8] sm:$0xff] }
  0x19   : > { %v1462_v32 = vpack.c.bf16 %v201_v30, %v200_v29  ;;  %v1009_v34 = vld [vmem:[%s1681_s19 + $0xe0] sm:$0xff]  ;;  %v202_v35 = vld [vmem:[%s1681_s19 + $0x50] sm:$0xff]  ;;  %v203_v36 = vld [vmem:[%s1681_s19 + $0x58] sm:$0xff] }
  0x1a   : > { %v1434_v37 = vpack.c.bf16 %v1009_v34, %v1008_v33  ;;  %v1466_v38 = vpack.c.bf16 %v203_v36, %v202_v35  ;;  %v1010_v39 = vld [vmem:[%s1681_s19 + $0xe8] sm:$0xff]  ;;  %v1011_v40 = vld [vmem:[%s1681_s19 + $0xf0] sm:$0xff]  ;;  %v204_v41 = vld [vmem:[%s1681_s19 + $0x60] sm:$0xff] }
  0x1b   : > { %v205_v42 = vld [vmem:[%s1681_s19 + $0x68] sm:$0xff]  ;;  %v1438_v43 = vpack.c.bf16 %v1011_v40, %v1010_v39  ;;  %v1012_v45 = vld [vmem:[%s1681_s19 + $0xf8] sm:$0xff]  ;;  %v1013_v46 = vld [vmem:[%s1681_s19 + $0x100] sm:$0xff] }
  0x1c   : > { %v1470_v44 = vpack.c.bf16 %v205_v42, %v204_v41  ;;  %v206_v47 = vld [vmem:[%s1681_s19 + $0x70] sm:$0xff]  ;;  %v207_v48 = vld [vmem:[%s1681_s19 + $0x78] sm:$0xff]  ;;  %v1442_v49 = vpack.c.bf16 %v1013_v46, %v1012_v45  ;;  %v1049_v51 = vld [vmem:[%s1681_s19 + $0x1] sm:$0xff] }
  0x1d   : > { %1420 = vmatpush3.bf16.xpose.msk.msra.mxu0 %vm1685_vm2, %v1418_v13  ;;  %v1474_v50 = vpack.c.bf16 %v207_v48, %v206_v47  ;;  %v1050_v52 = vld [vmem:[%s1681_s19 + $0x9] sm:$0xff]  ;;  %v1084_v54 = vld [vmem:[%s1681_s19 + $0x91] sm:$0xff]  ;;  %v1052_v60 = vld [vmem:[%s1681_s19 + $0x19] sm:$0xff] }
  0x1e   : > { %1452 = vmatpush3.bf16.xpose.msk.msra.mxu1 %vm1685_vm2, %v1450_v14  ;;  %1421 = vmatprep.subr.bf16.mxu0 %v1627_v0  ;;  %v1083_v53 = vld [vmem:[%s1681_s19 + $0x89] sm:$0xff]  ;;  %v1478_v56 = vpack.c.bf16 %v1050_v52, %v1049_v51  ;;  %v1051_v59 = vld [vmem:[%s1681_s19 + $0x11] sm:$0xff]  ;;  %v1085_v61 = vld [vmem:[%s1681_s19 + $0x99] sm:$0xff] }
  0x1f   : > { %1453 = vmatprep.subr.bf16.mxu1 %v1627_v0  ;;  %v1510_v58 = vpack.c.bf16 %v1084_v54, %v1083_v53  ;;  %v1086_v62 = vld [vmem:[%s1681_s19 + $0xa1] sm:$0xff]  ;;  %v1482_v63 = vpack.c.bf16 %v1052_v60, %v1051_v59  ;;  %v1054_v5 = vld [vmem:[%s1681_s19 + $0x29] sm:$0xff]  ;;  %v1088_v7 = vld [vmem:[%s1681_s19 + $0xb1] sm:$0xff]  ;;  %v1630_v53 = vmov 0  }
  0x20   : > { %v1514_v3 = vpack.c.bf16 %v1086_v62, %v1085_v61  ;;  %v1053_v4 = vld [vmem:[%s1681_s19 + $0x21] sm:$0xff]  ;;  %v1087_v6 = vld [vmem:[%s1681_s19 + $0xa9] sm:$0xff]  ;;  %v1055_v10 = vld [vmem:[%s1681_s19 + $0x31] sm:$0xff]  ;;  %1602 = vset.pattern.permute.xlu0 %v1630_v53 }
  0x21   : > { %v1486_v8 = vpack.c.bf16 %v1054_v5, %v1053_v4  ;;  %v1518_v9 = vpack.c.bf16 %v1088_v7, %v1087_v6  ;;  %v1056_v11 = vld [vmem:[%s1681_s19 + $0x39] sm:$0xff]  ;;  %v1090_v13 = vld [vmem:[%s1681_s19 + $0xc1] sm:$0xff]  ;;  %v1058_v17 = vld [vmem:[%s1681_s19 + $0x49] sm:$0xff] }
  0x22   : > { %v1089_v12 = vld [vmem:[%s1681_s19 + $0xb9] sm:$0xff]  ;;  %v1490_v14 = vpack.c.bf16 %v1056_v11, %v1055_v10  ;;  %v1057_v16 = vld [vmem:[%s1681_s19 + $0x41] sm:$0xff]  ;;  %v1091_v18 = vld [vmem:[%s1681_s19 + $0xc9] sm:$0xff] }
  0x23   : > { %v1522_v15 = vpack.c.bf16 %v1090_v13, %v1089_v12  ;;  %v1059_v22 = vld [vmem:[%s1681_s19 + $0x51] sm:$0xff]  ;;  %v1060_v23 = vld [vmem:[%s1681_s19 + $0x59] sm:$0xff]  ;;  %v1061_v28 = vld [vmem:[%s1681_s19 + $0x61] sm:$0xff] }
  0x24   : > { %v1093_v24 = vld [vmem:[%s1681_s19 + $0xd9] sm:$0xff]  ;;  %v1062_v29 = vld [vmem:[%s1681_s19 + $0x69] sm:$0xff]  ;;  %v1063_v34 = vld [vmem:[%s1681_s19 + $0x71] sm:$0xff] }
  0x25   : > { %1424 = vmatpush3.bf16.xpose.msk.msra.mxu0 %vm1685_vm2, %v1422_v19  ;;  %v1092_v19 = vld [vmem:[%s1681_s19 + $0xd1] sm:$0xff]  ;;  %v1095_v30 = vld [vmem:[%s1681_s19 + $0xe9] sm:$0xff]  ;;  %v1064_v35 = vld [vmem:[%s1681_s19 + $0x79] sm:$0xff] }
  0x26   : > { %1456 = vmatpush3.bf16.xpose.msk.msra.mxu1 %vm1685_vm2, %v1454_v20  ;;  %1425 = vmatprep.subr.bf16.mxu0 %v1627_v0  ;;  %v1494_v20 = vpack.c.bf16 %v1058_v17, %v1057_v16  ;;  %v1526_v21 = vpack.c.bf16 %v1092_v19, %v1091_v18  ;;  %v1097_v36 = vld [vmem:[%s1681_s19 + $0xf9] sm:$0xff]  ;;  %v1117_v40 = vld [vmem:[%s1681_s19 + $0x2] sm:$0xff]  ;;  %v1118_v41 = vld [vmem:[%s1681_s19 + $0xa] sm:$0xff] }
  0x27   : > { %1457 = vmatprep.subr.bf16.mxu1 %v1627_v0  ;;  %v1065_v42 = vld [vmem:[%s1930_s1 + $0x10] sm:$0xff]  ;;  %v1120_v46 = vld [vmem:[%s1681_s19 + $0x1a] sm:$0xff]  ;;  %v1121_v48 = vld [vmem:[%s1681_s19 + $0x22] sm:$0xff] }
  0x28   : > { %v1119_v45 = vld [vmem:[%s1681_s19 + $0x12] sm:$0xff]  ;;  %v190_v54 = vld [vmem:[%s1931_s2] sm:$0xff]  ;;  %v1130_v62 = vld [vmem:[%s1681_s19 + $0x6a] sm:$0xff] }
  0x29   : > { %v1546_v47 = vpack.c.bf16 %v1120_v46, %v1119_v45  ;;  %v1123_v51 = vld [vmem:[%s1681_s19 + $0x32] sm:$0xff]  ;;  %900 = vperm.xlu0 %1602, %v190_v54   ;;  %v1128_v59 = vld [vmem:[%s1681_s19 + $0x5a] sm:$0xff]  ;;  %v1129_v61 = vld [vmem:[%s1681_s19 + $0x62] sm:$0xff] }
  0x2a   : > { %v1132_v4 = vld [vmem:[%s1681_s19 + $0x7a] sm:$0xff] }
  0x2b   : > { %v1133_v6 = vld [vmem:[%s1930_s1 + $0x20] sm:$0xff] }
  0x2d   : > { %1428 = vmatpush3.bf16.xpose.msk.msra.mxu0 %vm1685_vm2, %v1426_v25  ;;  %v1094_v25 = vld [vmem:[%s1681_s19 + $0xe1] sm:$0xff] }
  0x2e   : > { %1460 = vmatpush3.bf16.xpose.msk.msra.mxu1 %vm1685_vm2, %v1458_v26  ;;  %1429 = vmatprep.subr.bf16.mxu0 %v1627_v0  ;;  %v1498_v26 = vpack.c.bf16 %v1060_v23, %v1059_v22  ;;  %v1530_v27 = vpack.c.bf16 %v1094_v25, %v1093_v24 }
  0x2f   : > { %1461 = vmatprep.subr.bf16.mxu1 %v1627_v0 }
  0x35   : > { %1432 = vmatpush3.bf16.xpose.msk.msra.mxu0 %vm1685_vm2, %v1430_v31  ;;  %v1096_v31 = vld [vmem:[%s1681_s19 + $0xf1] sm:$0xff] }
  0x36   : > { %1464 = vmatpush3.bf16.xpose.msk.msra.mxu1 %vm1685_vm2, %v1462_v32  ;;  %1433 = vmatprep.subr.bf16.mxu0 %v1627_v0  ;;  %v1502_v32 = vpack.c.bf16 %v1062_v29, %v1061_v28  ;;  %v1534_v33 = vpack.c.bf16 %v1096_v31, %v1095_v30 }
  0x37   : > { %1465 = vmatprep.subr.bf16.mxu1 %v1627_v0 }
  0x3d   : > { %1436 = vmatpush3.bf16.xpose.msk.msra.mxu0 %vm1685_vm2, %v1434_v37  ;;  %v1098_v37 = vld [vmem:[%s1681_s19 + $0x101] sm:$0xff] }
  0x3e   : > { %1468 = vmatpush3.bf16.xpose.msk.msra.mxu1 %vm1685_vm2, %v1466_v38  ;;  %1437 = vmatprep.subr.bf16.mxu0 %v1627_v0  ;;  %v1506_v38 = vpack.c.bf16 %v1064_v35, %v1063_v34  ;;  %v1538_v39 = vpack.c.bf16 %v1098_v37, %v1097_v36 }
  0x3f   : > { %1469 = vmatprep.subr.bf16.mxu1 %v1627_v0 }
  0x45   : > { %1440 = vmatpush3.bf16.xpose.msk.msra.mxu0 %vm1685_vm2, %v1438_v43  ;;  %v1542_v43 = vpack.c.bf16 %v1118_v41, %v1117_v40 }
  0x46   : > { %1472 = vmatpush3.bf16.xpose.msk.msra.mxu1 %vm1685_vm2, %v1470_v44  ;;  %1441 = vmatprep.subr.bf16.mxu0 %v1627_v0  ;;  %v1099_v44 = vld [vmem:[%s1930_s1 + $0x18] sm:$0xff] }
  0x47   : > { %1473 = vmatprep.subr.bf16.mxu1 %v1627_v0 }
  0x4d   : > { %1444 = vmatpush3.bf16.xpose.msk.msra.mxu0 %vm1685_vm2, %v1442_v49  ;;  %v1122_v49 = vld [vmem:[%s1681_s19 + $0x2a] sm:$0xff] }
  0x4e   : > { %1476 = vmatpush3.bf16.xpose.msk.msra.mxu1 %vm1685_vm2, %v1474_v50  ;;  %1477 = vmatprep.subr.bf16.mxu0 %v1627_v0  ;;  %v1550_v50 = vpack.c.bf16 %v1122_v49, %v1121_v48 }
  0x4f   : > { %1509 = vmatprep.subr.bf16.mxu1 %v1627_v0 }
  0x54   : > { %1271 = vmatmul.mubr.msk.f32.vlgmr.msra.gmra.mrb[0].mxu0 %vm229_vm1, %v1014_v55  ;;  %v1125_v55 = vld [vmem:[%s1681_s19 + $0x42] sm:$0xff] }
  0x55   : > { %1306 = vmatmul.mubr.msk.f32.vlgmr.msra.gmra.mrb[0].mxu1 %vm229_vm1, %v208_v57  ;;  %1480 = vmatpush3.bf16.xpose.msk.msra.mxu0 %vm1685_vm2, %v1478_v56  ;;  %v1126_v56 = vld [vmem:[%s1681_s19 + $0x4a] sm:$0xff] }
  0x56   : > { %1512 = vmatpush3.bf16.xpose.msk.msra.mxu1 %vm1685_vm2, %v1510_v58  ;;  %1481 = vmatprep.subr.bf16.mxu0 %v1627_v0  ;;  %v1558_v57 = vpack.c.bf16 %v1126_v56, %v1125_v55  ;;  %v1127_v58 = vld [vmem:[%s1681_s19 + $0x52] sm:$0xff] }
  0x57   : > { %1513 = vmatprep.subr.bf16.mxu1 %v1627_v0  ;;  %1340 = vmatprep.mubr.msk.f32.mxu0 %vm1628_vm0, %v1629_v1  ;;  %v1562_v60 = vpack.c.bf16 %v1128_v59, %v1127_v58 }
  0x58   : > { %1375 = vmatprep.mubr.msk.f32.mxu1 %vm1628_vm0, %v1629_v1 }
  0x5d   : > { %1484 = vmatpush3.bf16.xpose.msk.msra.mxu0 %vm1685_vm2, %v1482_v63  ;;  %v1566_v63 = vpack.c.bf16 %v1130_v62, %v1129_v61 }
  0x5e   : > { %1516 = vmatpush3.bf16.xpose.msk.msra.mxu1 %vm1685_vm2, %v1514_v3  ;;  %1485 = vmatprep.subr.bf16.mxu0 %v1627_v0  ;;  %v1131_v3 = vld [vmem:[%s1681_s19 + $0x72] sm:$0xff] }
  0x5f   : > { %1517 = vmatprep.subr.bf16.mxu1 %v1627_v0  ;;  %v1570_v5 = vpack.c.bf16 %v1132_v4, %v1131_v3 }
  0x65   : > { %1488 = vmatpush3.bf16.xpose.msk.msra.mxu0 %vm1685_vm2, %v1486_v8 }
  0x66   : > { %1520 = vmatpush3.bf16.xpose.msk.msra.mxu1 %vm1685_vm2, %v1518_v9  ;;  %1489 = vmatprep.subr.bf16.mxu0 %v1627_v0 }
  0x67   : > { %1521 = vmatprep.subr.bf16.mxu1 %v1627_v0 }
  0x6d   : > { %1492 = vmatpush3.bf16.xpose.msk.msra.mxu0 %vm1685_vm2, %v1490_v14 }
  0x6e   : > { %1524 = vmatpush3.bf16.xpose.msk.msra.mxu1 %vm1685_vm2, %v1522_v15  ;;  %1493 = vmatprep.subr.bf16.mxu0 %v1627_v0 }
  0x6f   : > { %1525 = vmatprep.subr.bf16.mxu1 %v1627_v0 }
  0x75   : > { %1496 = vmatpush3.bf16.xpose.msk.msra.mxu0 %vm1685_vm2, %v1494_v20 }
  0x76   : > { %1528 = vmatpush3.bf16.xpose.msk.msra.mxu1 %vm1685_vm2, %v1526_v21  ;;  %1497 = vmatprep.subr.bf16.mxu0 %v1627_v0 }
  0x77   : > { %1529 = vmatprep.subr.bf16.mxu1 %v1627_v0 }
  0x7d   : > { %1500 = vmatpush3.bf16.xpose.msk.msra.mxu0 %vm1685_vm2, %v1498_v26 }
  0x7e   : > { %1532 = vmatpush3.bf16.xpose.msk.msra.mxu1 %vm1685_vm2, %v1530_v27  ;;  %1501 = vmatprep.subr.bf16.mxu0 %v1627_v0 }
  0x7f   : > { %1533 = vmatprep.subr.bf16.mxu1 %v1627_v0 }
  0x85   : > { %1504 = vmatpush3.bf16.xpose.msk.msra.mxu0 %vm1685_vm2, %v1502_v32 }
  0x86   : > { %1536 = vmatpush3.bf16.xpose.msk.msra.mxu1 %vm1685_vm2, %v1534_v33  ;;  %1505 = vmatprep.subr.bf16.mxu0 %v1627_v0 }
  0x87   : > { %1537 = vmatprep.subr.bf16.mxu1 %v1627_v0 }
  0x8d   : > { %1508 = vmatpush3.bf16.xpose.msk.msra.mxu0 %vm1685_vm2, %v1506_v38 }
  0x8e   : > { %1540 = vmatpush3.bf16.xpose.msk.msra.mxu1 %vm1685_vm2, %v1538_v39  ;;  %1541 = vmatprep.subr.bf16.mxu0 %v1627_v0 }
  0x94   : > { %1341 = vmatmul.mubr.msk.f32.vlgmr.msra.gmra.mrb[2].mxu0 %vm229_vm1, %v1065_v42 }
  0x95   : > { %1544 = vmatpush3.bf16.xpose.msk.msra.mxu0 %vm1685_vm2, %v1542_v43  ;;  %1376 = vmatmul.mubr.msk.f32.vlgmr.msra.gmra.mrb[2].mxu1 %vm229_vm1, %v1099_v44 }
  0x96   : > { %1545 = vmatprep.subr.bf16.mxu0 %v1627_v0  ;;  %1410 = vmatprep.mubr.msk.f32.mxu0 %vm1628_vm0, %v1629_v1  ;;  %v1124_v1 = vld [vmem:[%s1681_s19 + $0x3a] sm:$0xff] }
  0x97   : > { %v1554_v52 = vpack.c.bf16 %v1124_v1, %v1123_v51 }
  0x9d   : > { %1548 = vmatpush3.bf16.xpose.msk.msra.mxu0 %vm1685_vm2, %v1546_v47 }
  0x9e   : > { %1549 = vmatprep.subr.bf16.mxu0 %v1627_v0 }
  0xa5   : > { %1552 = vmatpush3.bf16.xpose.msk.msra.mxu0 %vm1685_vm2, %v1550_v50 }
  0xa6   : > { %1553 = vmatprep.subr.bf16.mxu0 %v1627_v0 }
  0xa8   : > { %v901_v17 = vpop.permute.xlu0 %900 }
  0xad   : > { %1556 = vmatpush3.bf16.xpose.msk.msra.mxu0 %vm1685_vm2, %v1554_v52 }
  0xae   : > { %1557 = vmatprep.subr.bf16.mxu0 %v1627_v0 }
  0xb5   : > { %1560 = vmatpush3.bf16.xpose.msk.msra.mxu0 %vm1685_vm2, %v1558_v57 }
  0xb6   : > { %1561 = vmatprep.subr.bf16.mxu0 %v1627_v0 }
  0xbd   : > { %1564 = vmatpush3.bf16.xpose.msk.msra.mxu0 %vm1685_vm2, %v1562_v60 }
  0xbe   : > { %1565 = vmatprep.subr.bf16.mxu0 %v1627_v0 }
  0xc5   : > { %1568 = vmatpush3.bf16.xpose.msk.msra.mxu0 %vm1685_vm2, %v1566_v63 }
  0xc6   : > { %1569 = vmatprep.subr.bf16.mxu0 %v1627_v0 }
  0xcd   : > { %1572 = vmatpush3.bf16.xpose.msk.msra.mxu0 %vm1685_vm2, %v1570_v5 }
  0xd4   : > { %1411 = vmatmul.mubr.msk.f32.vlgmr.msra.gmra.mrb[4].mxu0 %vm229_vm1, %v1133_v6 }
 0x127   : > { %v347_v7 = vpop.f32.mrb[0].mxu0 }
 0x128   : > { %v1272_v8 = vpop.f32.mrb[1].mxu0  ;;  %v468_v9 = vpop.f32.mrb[0].mxu1 }
 0x129   : > { %v469_v10 = vadd.f32 %v468_v9, %v347_v7  ;;  %v1307_v11 = vpop.f32.mrb[1].mxu1 }
 0x167   : > { %v609_v12 = vpop.f32.mrb[2].mxu0 }
 0x168   : > { %v613_v0 = vadd.f32 %v609_v12, %v469_v10  ;;  %v1342_v13 = vpop.f32.mrb[3].mxu0  ;;  %v751_v14 = vpop.f32.mrb[2].mxu1 }
 0x169   : > { %v1377_v15 = vpop.f32.mrb[3].mxu1 }
 0x16a   : > { %v755_v16 = vadd.f32 %v751_v14, %v613_v0 }
 0x1a7   : > { %v893_v2 = vpop.f32.mrb[4].mxu0 }
 0x1a8   : > { %v897_v18 = vadd.f32 %v893_v2, %v755_v16  ;;  %v1412_v19 = vpop.f32.mrb[5].mxu0 }
 0x1aa   : > { %v903_v20 = vadd.f32 %v901_v17, %v897_v18 }
 0x1ac   : > { %v904_v21 = vmax.f32 %v903_v20, 0.0 }
 0x1ae   : > { %905 = vst [vmem:[%s188_s8] sm:$0xff] %v904_v21 }
 0x1af PF: > { %s13_s14 = sadd.s32 1, %s1625_s14   ;;  %s1935_s12 = smov %s1621_s13 }
 0x1b0   : > { %p10_p5 = scmp.ge.s32.totalorder %s13_s14, 4   ;;  %s1936_s13 = smov %s1938_s15 }
 0x1b2   :  { %12 = sbr.rel (!%p10_p5) target bundleno = 2 (0x2), region = 71 }

</bundles_post_ra>
